<compile_context>
chip_gen: v6e
topology: v6e:2x2x1
jax: 0.10.0
libtpu: 0.0.40
codegen_flags: <defaults>
</compile_context>

<pallas_src>
import jax
import jax.numpy as jnp
from jax.experimental import pallas as pl
from jax.experimental.pallas import tpu as pltpu


def _round_up(x, m):
    return (x + m - 1) // m * m


_SQRT_2_OVER_PI = 0.7978845608028654


def _gelu_tanh(x):
    # tanh-approximate GELU (== torch.nn.GELU(approximate='tanh')); tanh runs on
    # the EUP slot, the rest is cheap VPU math, all in f32.
    # TODO(synk): PyTorch nn.GELU() default is the exact erf form; difference is <~1e-3.
    return 0.5 * x * (1.0 + jnp.tanh(_SQRT_2_OVER_PI * (x + 0.044715 * (x * x * x))))


def _ffn_kernel(x_ref, w1_ref, b1_ref, w2_ref, b2_ref, o_ref):
    """One grid step = one row-tile of the flattened (M, dim) input.

    bf16 operands feed the MXU; accumulation and all element-wise math are f32.
    """
    x = x_ref[...].astype(jnp.bfloat16)                       # (tm, dim)

    # (tm, dim) @ (dim, hidden) -> f32 (tm, hidden)
    h = jnp.dot(x, w1_ref[...], preferred_element_type=jnp.float32)
    h = h + b1_ref[...]                                       # (1, hidden) broadcast
    h = _gelu_tanh(h)

    # (tm, hidden) @ (hidden, dim) -> f32 (tm, dim)
    y = jnp.dot(h.astype(jnp.bfloat16), w2_ref[...],
                preferred_element_type=jnp.float32)
    y = y + b2_ref[...]                                       # (1, dim) broadcast

    o_ref[...] = y.astype(o_ref.dtype)                        # lane-dense store


def feed_forward_pallas(x, w1, b1, w2, b2, *, block_rows=256):
    """x: (..., dim). Returns same shape/dtype as x."""
    orig_shape = x.shape
    dim = orig_shape[-1]
    hidden = w1.shape[1]
    assert w1.shape == (dim, hidden)
    assert b1.shape == (hidden,)
    assert w2.shape == (hidden, dim)
    assert b2.shape == (dim,)

    x2 = x.reshape(-1, dim)
    m = x2.shape[0]

    # Row tile: multiple of 8 (sublane), capped for pipelining over many tokens.
    tm = min(block_rows, _round_up(m, 8))
    m_pad = _round_up(m, tm)
    if m_pad != m:
        x2 = jnp.pad(x2, ((0, m_pad - m), (0, 0)))

    # Weights cast once to bf16 outside the kernel (halves HBM->VMEM DMA);
    # biases stay f32 (added to the f32 accumulators) and are reshaped 2-D.
    w1_b = w1.astype(jnp.bfloat16)
    w2_b = w2.astype(jnp.bfloat16)
    b1_2d = b1.reshape(1, hidden).astype(jnp.float32)
    b2_2d = b2.reshape(1, dim).astype(jnp.float32)

    grid = (m_pad // tm,)

    # NOTE: the constant-index weight/bias specs could also use
    # pipeline_mode=pl.Buffered(1) to single-buffer them and free VMEM at large
    # model sizes; left at the default here for maximum portability.
    out = pl.pallas_call(
        _ffn_kernel,
        out_shape=jax.ShapeDtypeStruct((m_pad, dim), x.dtype),
        grid=grid,
        in_specs=[
            pl.BlockSpec((tm, dim), lambda i: (i, 0)),        # x row-tile
            pl.BlockSpec((dim, hidden), lambda i: (0, 0)),    # w1 (resident)
            pl.BlockSpec((1, hidden), lambda i: (0, 0)),      # b1 (resident)
            pl.BlockSpec((hidden, dim), lambda i: (0, 0)),    # w2 (resident)
            pl.BlockSpec((1, dim), lambda i: (0, 0)),         # b2 (resident)
        ],
        out_specs=pl.BlockSpec((tm, dim), lambda i: (i, 0)),
        compiler_params=pltpu.CompilerParams(
            dimension_semantics=("parallel",),
            vmem_limit_bytes=32 * 1024 * 1024,
        ),
    )(x2, w1_b, b1_2d, w2_b, b2_2d)

    return out[:m].reshape(orig_shape)


def feed_forward_ref(x, w1, b1, w2, b2):
    """Pure-JAX f32 reference mirroring the PyTorch forward (dropout p=0)."""
    h = jnp.dot(x, w1) + b1
    h = _gelu_tanh(h)
    return jnp.dot(h, w2) + b2


if __name__ == "__main__":
    # Small token-shaped input consistent with the module: (batch, seq, dim).
    B, N, dim, hidden = 2, 8, 128, 256

    key = jax.random.PRNGKey(0)
    kx, k1, kb1, k2, kb2 = jax.random.split(key, 5)
    x = jax.random.normal(kx, (B, N, dim), dtype=jnp.float32)
    # Deterministic synthetic Linear params (stored pre-transposed).
    w1 = jax.random.normal(k1, (dim, hidden), dtype=jnp.float32) * (dim ** -0.5)
    b1 = jax.random.normal(kb1, (hidden,), dtype=jnp.float32) * 0.1
    w2 = jax.random.normal(k2, (hidden, dim), dtype=jnp.float32) * (hidden ** -0.5)
    b2 = jax.random.normal(kb2, (dim,), dtype=jnp.float32) * 0.1
    # TODO(synk): Dropout with p > 0 would need pltpu.prng_seed/prng_random_bits
    # masking; with the module default p = 0.0 it is an exact identity.

    out = feed_forward_pallas(x, w1, b1, w2, b2)
    jax.block_until_ready(out)

    ref = feed_forward_ref(x, w1, b1, w2, b2)
    max_err = jnp.max(jnp.abs(out - ref))
    # Tolerance covers bf16 rounding of the MXU operands (accumulation is f32).
    assert jnp.allclose(out, ref, atol=5e-2, rtol=5e-2), f"max err {max_err}"

    print("KERNEL_OK")
</pallas_src>

<mosaic_0001>
module attributes {stable_mosaic.version = 11 : i64} {
  func.func @_ffn_kernel(%arg0: i32, %arg1: memref<16x128xf32, #tpu.memory_space<vmem>>, %arg2: memref<128x256xbf16, #tpu.memory_space<vmem>>, %arg3: memref<1x256xf32, #tpu.memory_space<vmem>>, %arg4: memref<256x128xbf16, #tpu.memory_space<vmem>>, %arg5: memref<1x128xf32, #tpu.memory_space<vmem>>, %arg6: memref<16x128xf32, #tpu.memory_space<vmem>>) attributes {dimension_semantics = [#tpu.dimension_semantics<parallel>], iteration_bounds = array<i64: 1>, scalar_prefetch = 0 : i64, scratch_operands = 0 : i64, tpu.core_type = #tpu.core_type<tc>, window_params = [{transform_indices = @transform_0, window_bounds = array<i64: 16, 128>}, {pipeline_mode = #tpu.pipeline_mode<synchronous>, transform_indices = @transform_1, window_bounds = array<i64: 128, 256>}, {pipeline_mode = #tpu.pipeline_mode<synchronous>, transform_indices = @transform_2, window_bounds = array<i64: 1, 256>}, {pipeline_mode = #tpu.pipeline_mode<synchronous>, transform_indices = @transform_3, window_bounds = array<i64: 256, 128>}, {pipeline_mode = #tpu.pipeline_mode<synchronous>, transform_indices = @transform_4, window_bounds = array<i64: 1, 128>}, {transform_indices = @transform_5, window_bounds = array<i64: 16, 128>}]} {
    %c0 = arith.constant 0 : index
    %c0_0 = arith.constant 0 : index
    %0 = vector.load %arg1[%c0, %c0_0] : memref<16x128xf32, #tpu.memory_space<vmem>>, vector<16x128xf32>
    %1 = arith.truncf %0 : vector<16x128xf32> to vector<16x128xbf16>
    %c0_1 = arith.constant 0 : index
    %c0_2 = arith.constant 0 : index
    %2 = vector.load %arg2[%c0_1, %c0_2] : memref<128x256xbf16, #tpu.memory_space<vmem>>, vector<128x256xbf16>
    %cst = arith.constant dense<0.000000e+00> : vector<16x256xf32>
    %3 = tpu.matmul %1, %2, %cst {dimension_numbers = #tpu.dot_dimension_numbers<[1], [0], [0], [1], [0, 0, 1, 1], [], []>} : vector<16x128xbf16>, vector<128x256xbf16>, vector<16x256xf32> -> vector<16x256xf32>
    %c0_3 = arith.constant 0 : index
    %c0_4 = arith.constant 0 : index
    %4 = vector.load %arg3[%c0_3, %c0_4] : memref<1x256xf32, #tpu.memory_space<vmem>>, vector<1x256xf32>
    %5 = vector.broadcast %4 : vector<1x256xf32> to vector<16x256xf32>
    %6 = arith.addf %3, %5 : vector<16x256xf32>
    %cst_5 = arith.constant 5.000000e-01 : f32
    %7 = vector.broadcast %cst_5 : f32 to vector<16x256xf32>
    %8 = arith.mulf %7, %6 : vector<16x256xf32>
    %9 = arith.mulf %6, %6 : vector<16x256xf32>
    %10 = arith.mulf %9, %6 : vector<16x256xf32>
    %cst_6 = arith.constant 4.471500e-02 : f32
    %11 = vector.broadcast %cst_6 : f32 to vector<16x256xf32>
    %12 = arith.mulf %11, %10 : vector<16x256xf32>
    %13 = arith.addf %6, %12 : vector<16x256xf32>
    %cst_7 = arith.constant 0.797884583 : f32
    %14 = vector.broadcast %cst_7 : f32 to vector<16x256xf32>
    %15 = arith.mulf %14, %13 : vector<16x256xf32>
    %16 = math.tanh %15 : vector<16x256xf32>
    %cst_8 = arith.constant 1.000000e+00 : f32
    %17 = vector.broadcast %cst_8 : f32 to vector<16x256xf32>
    %18 = arith.addf %17, %16 : vector<16x256xf32>
    %19 = arith.mulf %8, %18 : vector<16x256xf32>
    %20 = arith.truncf %19 : vector<16x256xf32> to vector<16x256xbf16>
    %c0_9 = arith.constant 0 : index
    %c0_10 = arith.constant 0 : index
    %21 = vector.load %arg4[%c0_9, %c0_10] : memref<256x128xbf16, #tpu.memory_space<vmem>>, vector<256x128xbf16>
    %cst_11 = arith.constant dense<0.000000e+00> : vector<16x128xf32>
    %22 = tpu.matmul %20, %21, %cst_11 {dimension_numbers = #tpu.dot_dimension_numbers<[1], [0], [0], [1], [0, 0, 1, 1], [], []>} : vector<16x256xbf16>, vector<256x128xbf16>, vector<16x128xf32> -> vector<16x128xf32>
    %c0_12 = arith.constant 0 : index
    %c0_13 = arith.constant 0 : index
    %23 = vector.load %arg5[%c0_12, %c0_13] : memref<1x128xf32, #tpu.memory_space<vmem>>, vector<1x128xf32>
    %24 = vector.broadcast %23 : vector<1x128xf32> to vector<16x128xf32>
    %25 = arith.addf %22, %24 : vector<16x128xf32>
    %c0_14 = arith.constant 0 : index
    %c0_15 = arith.constant 0 : index
    %26 = vector.load %arg6[%c0_14, %c0_15] : memref<16x128xf32, #tpu.memory_space<vmem>>, vector<16x128xf32>
    tpu.vector_store %arg6[%c0_14, %c0_15], %25 {strides = array<i32>} : memref<16x128xf32, #tpu.memory_space<vmem>>, vector<16x128xf32>,
    return
  }
  func.func @transform_0(%arg0: i32) -> (i32, i32) {
    %c0_i32 = arith.constant 0 : i32
    %c0_i32_0 = arith.constant 0 : i32
    return %arg0, %c0_i32 : i32, i32
  }
  func.func @transform_1(%arg0: i32) -> (i32, i32) {
    %c0_i32 = arith.constant 0 : i32
    %c0_i32_0 = arith.constant 0 : i32
    %c0_i32_1 = arith.constant 0 : i32
    return %c0_i32, %c0_i32_0 : i32, i32
  }
  func.func @transform_2(%arg0: i32) -> (i32, i32) {
    %c0_i32 = arith.constant 0 : i32
    %c0_i32_0 = arith.constant 0 : i32
    %c0_i32_1 = arith.constant 0 : i32
    return %c0_i32, %c0_i32_0 : i32, i32
  }
  func.func @transform_3(%arg0: i32) -> (i32, i32) {
    %c0_i32 = arith.constant 0 : i32
    %c0_i32_0 = arith.constant 0 : i32
    %c0_i32_1 = arith.constant 0 : i32
    return %c0_i32, %c0_i32_0 : i32, i32
  }
  func.func @transform_4(%arg0: i32) -> (i32, i32) {
    %c0_i32 = arith.constant 0 : i32
    %c0_i32_0 = arith.constant 0 : i32
    %c0_i32_1 = arith.constant 0 : i32
    return %c0_i32, %c0_i32_0 : i32, i32
  }
  func.func @transform_5(%arg0: i32) -> (i32, i32) {
    %c0_i32 = arith.constant 0 : i32
    %c0_i32_0 = arith.constant 0 : i32
    return %arg0, %c0_i32 : i32, i32
  }
}

</mosaic_0001>

<bundles_post_ra>
// kernel: tpu_custom_call.1
= control target key start
LH: loop header
LB: loop body
LE: loop exit
PB: predicated region body
PF: predicated region fallthrough
CT: control target
= control target key end

     0   :  { %10 = vsyncpa [#allocation3], 0  ;;  %s715_s0 = inlined_call_operand.hbm [shape: f32[16,128], index: 0, kind: input, shape index: {}]   ;;  %s716_s1 = inlined_call_operand.hbm [shape: bf16[128,256], index: 1, kind: input, shape index: {}]   ;;  %s717_s2 = inlined_call_operand.vmem [shape: f32[1,256], index: 2, kind: input, shape index: {}]   ;;  %s718_s3 = inlined_call_operand.hbm [shape: bf16[256,128], index: 3, kind: input, shape index: {}]   ;;  %s719_s4 = inlined_call_operand.vmem [shape: f32[1,128], index: 4, kind: input, shape index: {}]   ;;  %s720_s5 = inlined_call_operand.hbm [shape: f32[16,128], index: 5, kind: output, shape index: {}]  }
   0x1   :  { %11 = vsyncpa [#allocation6], 0 }
   0x2   :  { %12 = vsyncpa [#allocation4], 0  ;;  %s649_s18 = smov [#allocation5]   ;;  %s650_s20 = smov [#allocation2]  }
   0x3   :  { %s30_s19 = sshll.u32 %s649_s18, 4  ;;  %s18_s21 = sshll.u32 %s650_s20, 4  ;;  %s31_s19 = int_to_ptr.vmem [resolvable:$true] %s30_s19  ;;  %s19_s21 = int_to_ptr.vmem [resolvable:$true] %s18_s21 }
   0x4   :  { %s571_s22 = scalar_lea.vmem %s31_s19, 2048  ;;  %p576_p1 = scmp.lt.s32.totalorder %s31_s19, %s31_s19 }
   0x5   :  { %p572_p0 = scmp.ne.s32.totalorder %s31_s19, %s571_s22  ;;  %p577_p2 = scmp.lt.s32.totalorder %s571_s22, %s571_s22 }
   0x7   :  { %p578_p3 = por %p577_p2, %p576_p1 }
   0x9   :  { %p579_p4 = pnand %p578_p3, %p572_p0 }
   0xb   :  { %582 = shalt.err (!%p579_p4)
}
   0xc   :  { %s651_s23 = smov 128   ;;  %s652_s24 = smov 8  }
   0xd   :  { %36 = dma.hbm_to_vmem [thread:$0]  %s716_s1, 2048, %s31_s19, [#allocation6], %s651_s23, %s651_s23, %s652_s24  }
   0xe   :  { %s591_s27 = scalar_lea.vmem %s19_s21, 256  ;;  %p596_p6 = scmp.lt.s32.totalorder %s19_s21, %s19_s21 }
   0xf   :  { %p592_p5 = scmp.ne.s32.totalorder %s19_s21, %s591_s27  ;;  %p597_p7 = scmp.lt.s32.totalorder %s591_s27, %s591_s27 }
  0x11   :  { %p598_p8 = por %p597_p7, %p596_p6 }
  0x13   :  { %p599_p9 = pnand %p598_p8, %p592_p5 }
  0x15   :  { %602 = shalt.err (!%p599_p9)
}
  0x16   :  { %24 = dma.hbm_to_vmem [thread:$0]  %s715_s0, 256, %s19_s21, [#allocation3], %s651_s23, %s651_s23, %s652_s24  }
  0x17   :  { %s653_s30 = smov [#allocation7]  }
  0x18   :  { %s44_s6 = sshll.u32 %s653_s30, 4  ;;  %s45_s6 = int_to_ptr.vmem [resolvable:$true] %s44_s6 }
  0x19   :  { %s611_s7 = scalar_lea.vmem %s45_s6, 2048  ;;  %p616_p11 = scmp.lt.s32.totalorder %s45_s6, %s45_s6 }
  0x1a   :  { %p612_p10 = scmp.ne.s32.totalorder %s45_s6, %s611_s7  ;;  %p617_p12 = scmp.lt.s32.totalorder %s611_s7, %s611_s7 }
  0x1c   :  { %p618_p13 = por %p617_p12, %p616_p11 }
  0x1e   :  { %p619_p0 = pnand %p618_p13, %p612_p10 }
  0x20   :  { %622 = shalt.err (!%p619_p0)
}
  0x21   :  { %s654_s1 = smov 64   ;;  %s655_s8 = smov 4  }
  0x22   :  { %50 = dma.hbm_to_vmem [thread:$0]  %s718_s3, 2048, %s45_s6, [#allocation6], %s654_s1, %s654_s1, %s655_s8  }
  0x23   :  { %643 = dma.done.wait [#allocation3], 256  }
  0x24   :  { %644 = vsyncadd [#allocation3], 4294967040 }
  0x25   :  { %645 = dma.done.wait [#allocation6], 4096  }
  0x26   :  { %646 = vsyncadd [#allocation6], 4294963200  ;;  %v656_v0 = vmov 0   ;;  %v515_v1 = vld [vmem:[#allocation5 + $0x74] ss:$8 sps:$4 sm:$0xff]   ;;  %v543_v24 = vld [vmem:[#allocation7 + $0x68] sm:$0xff]   ;;  %v84_v36 = vlaneseq }
  0x27   :  { %206 = vmatprep.mubr.bf16.mxu0 %v656_v0  ;;  %v517_v2 = vld [vmem:[#allocation5 + $0x70] ss:$8 sps:$4 sm:$0xff]   ;;  %174 = vmatprep.subr.bf16.mxu0 %v515_v1  ;;  %v518_v3 = vld [vmem:[#allocation5 + $0x64] ss:$8 sps:$4 sm:$0xff]   ;;  %v520_v4 = vld [vmem:[#allocation5 + $0x60] ss:$8 sps:$4 sm:$0xff]  }
  0x28   :  { %175 = vmatpush1.bf16.msra.mxu0 %v517_v2  ;;  %v521_v5 = vld [vmem:[#allocation5 + $0x54] ss:$8 sps:$4 sm:$0xff]   ;;  %v523_v6 = vld [vmem:[#allocation5 + $0x50] ss:$8 sps:$4 sm:$0xff]   ;;  %v524_v7 = vld [vmem:[#allocation5 + $0x44] ss:$8 sps:$4 sm:$0xff]  }
  0x29   :  { %176 = vmatprep.subr.bf16.mxu0 %v518_v3  ;;  %v526_v8 = vld [vmem:[#allocation5 + $0x40] ss:$8 sps:$4 sm:$0xff]   ;;  %v527_v9 = vld [vmem:[#allocation5 + $0x34] ss:$8 sps:$4 sm:$0xff]   ;;  %v529_v10 = vld [vmem:[#allocation5 + $0x30] ss:$8 sps:$4 sm:$0xff]  }
  0x2a   :  { %v530_v11 = vld [vmem:[#allocation5 + $0x24] ss:$8 sps:$4 sm:$0xff]   ;;  %v532_v12 = vld [vmem:[#allocation5 + $0x20] ss:$8 sps:$4 sm:$0xff]   ;;  %v533_v13 = vld [vmem:[#allocation5 + $0x14] ss:$8 sps:$4 sm:$0xff]  }
  0x2b   :  { %v535_v14 = vld [vmem:[#allocation5 + $0x10] ss:$8 sps:$4 sm:$0xff]   ;;  %v536_v15 = vld [vmem:[#allocation5 + $0x4] ss:$8 sps:$4 sm:$0xff]   ;;  %v538_v16 = vld [vmem:[#allocation5] ss:$8 sps:$4 sm:$0xff]  }
  0x2c   :  { %177 = vmatpush1.bf16.msra.mxu0 %v520_v4  ;;  %v63_v17 = vld [vmem:[#allocation2] sm:$0xff]  ;;  %v64_v18 = vld [vmem:[#allocation2 + $0x8] sm:$0xff]  ;;  %v544_v25 = vld [vmem:[#allocation7 + $0x28] sm:$0xff]   ;;  %v85_v37 = vshrl.u32 %v84_v36, 7  ;;  %s657_s12 = smov [#allocation8]  }
  0x2d   :  { %178 = vmatprep.subr.bf16.mxu0 %v521_v5  ;;  %v65_v19 = vpack.c.bf16 %v64_v18, %v63_v17  ;;  %v539_v20 = vld [vmem:[#allocation7 + $0x78] sm:$0xff]   ;;  %v541_v22 = vld [vmem:[#allocation7 + $0x70] sm:$0xff]   ;;  %v545_v26 = vld [vmem:[#allocation7 + $0x60] sm:$0xff]   ;;  %s438_s13 = sshll.u32 %s657_s12, 4  ;;  %s439_s13 = int_to_ptr.vmem [resolvable:$true] %s438_s13 }
  0x2e   :  { %v540_v21 = vld [vmem:[#allocation7 + $0x38] sm:$0xff]   ;;  %484 = vmatprep.subr.bf16.mxu1 %v539_v20  ;;  %v542_v23 = vld [vmem:[#allocation7 + $0x30] sm:$0xff]   ;;  %v546_v27 = vld [vmem:[#allocation7 + $0x20] sm:$0xff]   ;;  %v86_v38 = vsub.s32 0, %v85_v37  ;;  %v90_v40 = vsub.s32 1, %v85_v37  ;;  %s623_s14 = scalar_lea.vmem %s439_s13, 256  ;;  %p628_p2 = scmp.lt.s32.totalorder %s439_s13, %s439_s13 }
  0x2f   :  { %485 = vmatpush3.bf16.msra.mxu1 %v540_v21  ;;  %v547_v28 = vld [vmem:[#allocation7 + $0x58] sm:$0xff]   ;;  %v549_v30 = vld [vmem:[#allocation7 + $0x50] sm:$0xff]   ;;  %v551_v32 = vld [vmem:[#allocation7 + $0x48] sm:$0xff]   ;;  %p624_p1 = scmp.ne.s32.totalorder %s439_s13, %s623_s14  ;;  %p629_p3 = scmp.lt.s32.totalorder %s623_s14, %s623_s14 }
  0x30   :  { %179 = vmatpush1.bf16.msra.mxu0 %v523_v6  ;;  %486 = vmatprep.subr.bf16.mxu1 %v541_v22  ;;  %v548_v29 = vld [vmem:[#allocation7 + $0x18] sm:$0xff]   ;;  %v550_v31 = vld [vmem:[#allocation7 + $0x10] sm:$0xff]   ;;  %v552_v33 = vld [vmem:[#allocation7 + $0x8] sm:$0xff]  }
  0x31   :  { %180 = vmatprep.subr.bf16.mxu0 %v524_v7  ;;  %v553_v34 = vld [vmem:[#allocation7 + $0x40] sm:$0xff]   ;;  %v82_v39 = vld [vmem:[%s717_s2] sm:$0x3]  ;;  %p630_p4 = por %p629_p3, %p628_p2 }
  0x32   :  { %v554_v35 = vld [vmem:[#allocation7] sm:$0xff]   ;;  %v87_v41 = vrot.slane %v82_v39, %v86_v38  ;;  %v91_v42 = vrot.slane %v82_v39, %v90_v40 }
  0x33   :  { %487 = vmatpush3.bf16.msra.mxu1 %v542_v23  ;;  %p631_p5 = pnand %p630_p4, %p624_p1 }
  0x34   :  { %181 = vmatpush1.bf16.msra.mxu0 %v526_v8  ;;  %488 = vmatprep.subr.bf16.mxu1 %v543_v24 }
  0x35   :  { %182 = vmatprep.subr.bf16.mxu0 %v527_v9 }
  0x37   :  { %489 = vmatpush3.bf16.msra.mxu1 %v544_v25 }
  0x38   :  { %183 = vmatpush1.bf16.msra.mxu0 %v529_v10  ;;  %490 = vmatprep.subr.bf16.mxu1 %v545_v26  ;;  %v467_v26 = vld [vmem:[%s719_s4] ss:$0 sm:$0xff] }
  0x39   :  { %184 = vmatprep.subr.bf16.mxu0 %v530_v11 }
  0x3b   :  { %491 = vmatpush3.bf16.msra.mxu1 %v546_v27 }
  0x3c   :  { %185 = vmatpush1.bf16.msra.mxu0 %v532_v12  ;;  %492 = vmatprep.subr.bf16.mxu1 %v547_v28 }
  0x3d   :  { %186 = vmatprep.subr.bf16.mxu0 %v533_v13 }
  0x3f   :  { %493 = vmatpush3.bf16.msra.mxu1 %v548_v29 }
  0x40   :  { %187 = vmatpush1.bf16.msra.mxu0 %v535_v14  ;;  %494 = vmatprep.subr.bf16.mxu1 %v549_v30 }
  0x41   :  { %188 = vmatprep.subr.bf16.mxu0 %v536_v15 }
  0x43   :  { %495 = vmatpush3.bf16.msra.mxu1 %v550_v31 }
  0x44   :  { %189 = vmatpush1.bf16.msra.mxu0 %v538_v16  ;;  %496 = vmatprep.subr.bf16.mxu1 %v551_v32 }
  0x47   :  { %207 = vmatmul.mubr.bf16.vlgmr.msra.gmra.mxu0 %v65_v19  ;;  %497 = vmatpush3.bf16.msra.mxu1 %v552_v33 }
  0x48   :  { %498 = vmatprep.subr.bf16.mxu1 %v553_v34 }
  0x4b   :  { %499 = vmatpush3.bf16.msra.mxu1 %v554_v35 }
 0x107   :  { %v208_v43 = vpop.f32.mrf.mxu0 }
 0x108   :  { %v209_v44 = vadd.f32 %v208_v43, %v87_v41 }
 0x109   :  { %v210_v45 = vpop.f32.mrf.mxu0 }
 0x10a   :  { %v221_v46 = vmul.f32 %v209_v44, %v209_v44  ;;  %v211_v47 = vadd.f32 %v210_v45, %v91_v42  ;;  %v217_v18 = vmul.f32 0.5, %v209_v44 }
 0x10b   :  { %v212_v48 = vpop.f32.mrf.mxu0 }
 0x10c   :  { %v225_v49 = vmul.f32 %v221_v46, %v209_v44  ;;  %v222_v50 = vmul.f32 %v211_v47, %v211_v47  ;;  %v213_v51 = vadd.f32 %v212_v48, %v87_v41  ;;  %v218_v15 = vmul.f32 0.5, %v211_v47 }
 0x10d   :  { %v214_v52 = vpop.f32.mrf.mxu0 }
 0x10e   :  { %v229_v53 = vmul.f32 0.044715, %v225_v49  ;;  %v226_v54 = vmul.f32 %v222_v50, %v211_v47  ;;  %v223_v55 = vmul.f32 %v213_v51, %v213_v51  ;;  %v215_v56 = vadd.f32 %v214_v52, %v91_v42 }
 0x10f   :  { %v219_v13 = vmul.f32 0.5, %v213_v51 }
 0x110   :  { %v233_v57 = vadd.f32 %v229_v53, %v209_v44  ;;  %v230_v58 = vmul.f32 0.044715, %v226_v54  ;;  %v227_v59 = vmul.f32 %v223_v55, %v213_v51  ;;  %v224_v60 = vmul.f32 %v215_v56, %v215_v56 }
 0x111   :  { %v220_v16 = vmul.f32 0.5, %v215_v56 }
 0x112   :  { %v231_v61 = vmul.f32 0.044715, %v227_v59  ;;  %v228_v62 = vmul.f32 %v224_v60, %v215_v56  ;;  %v234_v63 = vadd.f32 %v230_v58, %v211_v47  ;;  %v237_v0 = vmul.f32 0.7978846, %v233_v57 }
 0x114   :  { %v235_v1 = vadd.f32 %v231_v61, %v213_v51  ;;  %v232_v2 = vmul.f32 0.044715, %v228_v62  ;;  %v238_v3 = vmul.f32 0.7978846, %v234_v63 }
 0x116   :  { %v239_v4 = vmul.f32 0.7978846, %v235_v1  ;;  %v236_v5 = vadd.f32 %v232_v2, %v215_v56  ;;  %555 = vtanh.f32 %v238_v3 }
 0x117   :  { %557 = vtanh.f32 %v237_v0 }
 0x118   :  { %559 = vtanh.f32 %v239_v4  ;;  %v240_v6 = vmul.f32 0.7978846, %v236_v5 }
 0x11a   :  { %561 = vtanh.f32 %v240_v6 }
 0x123   :  { %v556_v7 = vpop.eup %555 }
 0x124   :  { %v558_v8 = vpop.eup %557  ;;  %v246_v10 = vadd.f32 1.0, %v556_v7 }
 0x125   :  { %v560_v9 = vpop.eup %559  ;;  %v245_v14 = vadd.f32 1.0, %v558_v8 }
 0x126   :  { %v247_v11 = vadd.f32 1.0, %v560_v9  ;;  %v250_v20 = vmul.f32 %v246_v10, %v218_v15 }
 0x127   :  { %v562_v12 = vpop.eup %561  ;;  %v249_v22 = vmul.f32 %v245_v14, %v217_v18 }
 0x128   :  { %v248_v17 = vadd.f32 1.0, %v562_v12  ;;  %v251_v19 = vmul.f32 %v247_v11, %v219_v13 }
 0x12a   :  { %v252_v21 = vmul.f32 %v248_v17, %v220_v16  ;;  %v253_v24 = vpack.c.bf16 %v251_v19, %v249_v22 }
 0x12c   :  { %v254_v23 = vpack.c.bf16 %v252_v21, %v250_v20 }
 0x12e   :  { %422 = vmatprep.mubr.bf16.mxu1 %v254_v23 }
 0x12f   :  { %423 = vmatmul.mubr.bf16.vlgmr.msra.gmra.mxu1 %v253_v24 }
 0x1ef   :  { %v500_v25 = vpop.f32.mrf.mxu1 }
 0x1f1   :  { %v501_v27 = vpop.f32.mrf.mxu1 }
 0x1f2   :  { %v502_v28 = vadd.f32 %v501_v27, %v500_v25 }
 0x1f3   :  { %v503_v29 = vpop.f32.mrf.mxu1 }
 0x1f4   :  { %v425_v30 = vadd.f32 %v502_v28, %v467_v26 }
 0x1f5   :  { %v504_v31 = vpop.f32.mrf.mxu1 }
 0x1f6   :  { %431 = vst [vmem:[#allocation8] sm:$0xff] %v425_v30  ;;  %v505_v32 = vadd.f32 %v504_v31, %v503_v29 }
 0x1f8   :  { %v428_v33 = vadd.f32 %v505_v32, %v467_v26 }
 0x1fa   :  { %432 = vst [vmem:[#allocation8 + $0x8] sm:$0xff] %v428_v33 }
 0x1fb   :  { %634 = shalt.err (!%p631_p5)
}
 0x1fc   :  { %444 = dma.vmem_to_hbm [thread:$0]  %s439_s13, 256, %s720_s5, [#allocation4], %s651_s23, %s651_s23, %s652_s24  }
 0x1fd   :  { %647 = dma.done.wait [#allocation4], 256  }
 0x1fe   :  { %648 = vsyncadd [#allocation4], 4294967040 }
 0x1ff   :  { %448 = vsyncpa [#allocation3], 1 }
 0x200   :  { %449 = vsyncpa [#allocation6], 1 }
 0x201   :  { %450 = vsyncpa [#allocation4], 1 }

</bundles_post_ra>
